<compile_context>
chip_gen: v7x
topology: tpu7x:2x2x1
jax: 0.10.0
libtpu: 0.0.40
codegen_flags: <defaults>
</compile_context>

<pallas_src>
import jax
import jax.numpy as jnp
from jax.experimental import pallas as pl
from jax.experimental.pallas import tpu as pltpu


def conv1x1_cat_kernel(w_ref, x_ref, o_ref):
    scale = w_ref[0]              # scalar weight, read once from SMEM
    y = x_ref[...] * scale        # (N, HW) -- the whole 1x1 conv
    # torch.cat((y, y), dim=1): two direct stores reusing the same y vregs.
    o_ref[:, 0, :] = y
    o_ref[:, 1, :] = y


def conv_cat(x, w):
    """x: (N, 1, H, W), w: (1, 1, 1, 1)  ->  (N, 2, H, W)  (NCHW, like PyTorch)."""
    N, C, H, W = x.shape
    assert C == 1, "Conv2d(1, 1, 1) expects a single input channel"
    HW = H * W

    x_flat = x.reshape(N, HW)                    # lane-dense last dim (256 here)
    # For the f32/f32 test case this cast is exact; with mixed precision the
    # multiply happens in x.dtype (matches doing the conv in activation dtype).
    w_scalar = w.reshape((1,)).astype(x.dtype)

    out_flat = pl.pallas_call(
        conv1x1_cat_kernel,
        out_shape=jax.ShapeDtypeStruct((N, 2, HW), x.dtype),
        in_specs=[
            pl.BlockSpec(memory_space=pltpu.SMEM),   # scalar weight
            pl.BlockSpec(memory_space=pltpu.VMEM),   # whole x, single block
        ],
        out_specs=pl.BlockSpec(memory_space=pltpu.VMEM),
    )(w_scalar, x_flat)

    # (N, 2, H*W) is contiguous-compatible with NCHW (N, 2, H, W): free reshape.
    return out_flat.reshape(N, 2, H, W)


if __name__ == "__main__":
    key = jax.random.PRNGKey(0)
    kx, kw = jax.random.split(key)

    # Small shapes consistent with the module: batch=2, in_channels=1, 16x16.
    x = jax.random.normal(kx, (2, 1, 16, 16), dtype=jnp.float32)
    # Conv weight, shape (out_ch=1, in_ch=1, kH=1, kW=1).
    w = jax.random.normal(kw, (1, 1, 1, 1), dtype=jnp.float32)

    out = jax.block_until_ready(conv_cat(x, w))

    # Reference: conv (scalar multiply) then cat along channel dim.
    y_ref = x * w[0, 0, 0, 0]
    ref = jnp.concatenate([y_ref, y_ref], axis=1)

    assert out.shape == (2, 2, 16, 16), out.shape
    assert jnp.allclose(out, ref, atol=1e-6, rtol=1e-6), "mismatch vs reference"
    print("KERNEL_OK")
</pallas_src>

<mosaic_0001>
module attributes {stable_mosaic.version = 11 : i64} {
  func.func @conv1x1_cat_kernel(%arg0: memref<1xf32, #tpu.memory_space<smem>>, %arg1: memref<2x256xf32, #tpu.memory_space<vmem>>, %arg2: memref<2x2x256xf32, #tpu.memory_space<vmem>>) attributes {dimension_semantics = [], scalar_prefetch = 0 : i64, scratch_operands = 0 : i64, tpu.core_type = #tpu.core_type<tc>} {
    %c0 = arith.constant 0 : index
    %0 = memref.load %arg0[%c0] : memref<1xf32, #tpu.memory_space<smem>>
    %c0_0 = arith.constant 0 : index
    %c0_1 = arith.constant 0 : index
    %1 = vector.load %arg1[%c0_0, %c0_1] : memref<2x256xf32, #tpu.memory_space<vmem>>, vector<2x256xf32>
    %2 = vector.broadcast %0 : f32 to vector<2x256xf32>
    %3 = arith.mulf %1, %2 : vector<2x256xf32>
    %c0_2 = arith.constant 0 : index
    %c0_3 = arith.constant 0 : index
    %c0_4 = arith.constant 0 : index
    %4 = vector.load %arg2[%c0_2, %c0_3, %c0_4] : memref<2x2x256xf32, #tpu.memory_space<vmem>>, vector<2x1x256xf32>
    %5 = vector.shape_cast %4 : vector<2x1x256xf32> to vector<2x256xf32>
    %6 = vector.shape_cast %3 : vector<2x256xf32> to vector<2x1x256xf32>
    tpu.vector_store %arg2[%c0_2, %c0_3, %c0_4], %6 {strides = array<i32>} : memref<2x2x256xf32, #tpu.memory_space<vmem>>, vector<2x1x256xf32>,
    %c0_5 = arith.constant 0 : index
    %c1 = arith.constant 1 : index
    %c0_6 = arith.constant 0 : index
    %7 = vector.load %arg2[%c0_5, %c1, %c0_6] : memref<2x2x256xf32, #tpu.memory_space<vmem>>, vector<2x1x256xf32>
    %8 = vector.shape_cast %7 : vector<2x1x256xf32> to vector<2x256xf32>
    %9 = vector.shape_cast %3 : vector<2x256xf32> to vector<2x1x256xf32>
    tpu.vector_store %arg2[%c0_5, %c1, %c0_6], %9 {strides = array<i32>} : memref<2x2x256xf32, #tpu.memory_space<vmem>>, vector<2x1x256xf32>,
    return
  }
}

</mosaic_0001>

<bundles_post_ra>
// kernel: tpu_custom_call.1
= control target key start
LH: loop header
LB: loop body
LE: loop exit
PB: predicated region body
PF: predicated region fallthrough
CT: control target
= control target key end

     0   :  { %8 = vsyncpa [#allocation4], 0  ;;  %s168_s0 = inlined_call_operand.<no memory space> [shape: f32[1], index: 0, kind: input, shape index: {}]   ;;  %s169_s1 = inlined_call_operand.hbm [shape: f32[2,256], index: 1, kind: input, shape index: {}]   ;;  %s170_s2 = inlined_call_operand.hbm [shape: f32[2,2,256], index: 2, kind: output, shape index: {}]  }
   0x1   :  { %9 = vsyncpa [#allocation5], 0  ;;  %s121_s9 = smov [#allocation3]   ;;  %s73_s13 = scalar_lea.hbm %s169_s1, 64 }
   0x2   :  { %s18_s10 = sshll.u32 %s121_s9, 4  ;;  %p74_p0 = scmp.ne.s32.totalorder %s169_s1, %s73_s13  ;;  %s19_s10 = int_to_ptr.vmem [resolvable:$true] %s18_s10 }
   0x3   :  { %p77_p1 = scmp.lt.u32.totalorder %s73_s13, %s169_s1 }
   0x5   :  { %p79_p2 = pnand %p77_p1, %p74_p0 }
   0x7   :  { %82 = shalt.err (!%p79_p2)
}
   0x8   :  { %s83_s18 = scalar_lea.vmem %s19_s10, 64  ;;  %p88_p4 = scmp.lt.s32.totalorder %s19_s10, %s19_s10 }
   0x9   :  { %p84_p3 = scmp.ne.s32.totalorder %s19_s10, %s83_s18  ;;  %p89_p5 = scmp.lt.s32.totalorder %s83_s18, %s83_s18 }
   0xb   :  { %p90_p6 = por %p89_p5, %p88_p4 }
   0xd   :  { %p91_p7 = pnand %p90_p6, %p84_p3 }
   0xf   :  { %94 = shalt.err (!%p91_p7)
}
  0x10   :  { %21 = dma.hbm_to_vmem [thread:$0]  %s169_s1, 64, %s19_s10, [#allocation4]  }
  0x11   :  { %117 = dma.done.wait [#allocation4], 64  }
  0x12   :  { %118 = vsyncadd [#allocation4], 4294967232  ;;  %v33_v0 = vlaneseq  ;;  %v122_v1 = vmov 1966171168   ;;  %v27_v5 = vstv %s168_s0  ;;  %v26_v7 = vld [vmem:[#allocation3] sm:$0xf] }
  0x13   :  { %v31_v2 = vunpack.c.l.s4 %v122_v1  ;;  %v28_v8 = vmul.f32 %v27_v5, %v26_v7  ;;  %s123_s23 = smov [#allocation6]  }
  0x14   :  { %v34_v3 = vshrl.u32 %v33_v0, 7  ;;  %vm42_vm0 = vcmp.lt.s32.totalorder %v33_v0, 256  ;;  %s56_s24 = sshll.u32 %s123_s23, 4  ;;  %s57_s24 = int_to_ptr.vmem [resolvable:$true] %s56_s24 }
  0x15   :  { %v32_v4 = vunpack.c.0.s8 %v31_v2  ;;  %s95_s1 = scalar_lea.vmem %s57_s24, 128  ;;  %p100_p9 = scmp.lt.s32.totalorder %s57_s24, %s57_s24 }
  0x16   :  { %p96_p8 = scmp.ne.s32.totalorder %s57_s24, %s95_s1  ;;  %p101_p10 = scmp.lt.s32.totalorder %s95_s1, %s95_s1 }
  0x17   :  { %v35_v6 = vsub.s32 %v32_v4, %v34_v3 }
  0x18   :  { %p102_p11 = por %p101_p10, %p100_p9 }
  0x19   :  { %v36_v9 = vrot.slane %v28_v8, %v35_v6 }
  0x1a   :  { %p103_p12 = pnand %p102_p11, %p96_p8 }
  0x1b   :  { %44 = vst.msk [vmem:[#allocation6] ss:$2 sm:$0x3] %vm42_vm0, %v36_v9  ;;  %48 = vst.msk [vmem:[#allocation6 + $0x1] ss:$2 sm:$0x3] %vm42_vm0, %v36_v9  ;;  %v37_v10 = vcombine.high %v36_v9, %v36_v9 }
  0x1d   :  { %46 = vst.msk [vmem:[#allocation6 + $0x4] ss:$2 sm:$0x3] %vm42_vm0, %v37_v10  ;;  %50 = vst.msk [vmem:[#allocation6 + $0x5] ss:$2 sm:$0x3] %vm42_vm0, %v37_v10 }
  0x1e   :  { %106 = shalt.err (!%p103_p12)
}
  0x1f   :  { %s107_s26 = scalar_lea.hbm %s170_s2, 128 }
  0x20   :  { %p108_p13 = scmp.ne.s32.totalorder %s170_s2, %s107_s26  ;;  %p111_p0 = scmp.lt.u32.totalorder %s107_s26, %s170_s2 }
  0x22   :  { %p113_p1 = pnand %p111_p0, %p108_p13 }
  0x24   :  { %116 = shalt.err (!%p113_p1)
}
  0x25   :  { %s124_s3 = smov 64   ;;  %s125_s4 = smov 4  }
  0x26   :  { %62 = dma.vmem_to_hbm [thread:$0]  %s57_s24, 128, %s170_s2, [#allocation5], %s124_s3, %s124_s3, %s125_s4  }
  0x27   :  { %119 = dma.done.wait [#allocation5], 128  }
  0x28   :  { %120 = vsyncadd [#allocation5], 4294967168 }
  0x29   :  { %66 = vsyncpa [#allocation4], 1 }
  0x2a   :  { %67 = vsyncpa [#allocation5], 1 }

</bundles_post_ra>
